<compile_context>
chip_gen: v7x
topology: tpu7x:2x2x1
jax: 0.10.0
libtpu: 0.0.40
codegen_flags: <defaults>
</compile_context>

<pallas_src>
import jax
import jax.numpy as jnp
from jax.experimental import pallas as pl
from jax.experimental.pallas import tpu as pltpu


_LANE = 128
_MAX_S2 = 4096                          # target folded lane width: 128..4096
_BLOCK_BYTES = 4 * 1024 * 1024          # ~4 MiB image block target
_TOTAL_VMEM_BUDGET = 24 * 1024 * 1024   # double-buffered in+out+stats budget
_VMEM_LIMIT = 32 * 1024 * 1024          # = v6e/v7x default scoped VMEM


def _normalize_kernel(x_ref, scale_ref, bias_ref, o_ref):
    # x_ref: [TR, S2] image tile; scale_ref/bias_ref: [TR, 1] f32 per-row
    # stats (broadcast along lanes); o_ref: [TR, S2].
    x = x_ref[...].astype(jnp.float32)
    o_ref[...] = (x * scale_ref[...] + bias_ref[...]).astype(o_ref.dtype)


def _round_up(n, m):
    return ((n + m - 1) // m) * m


def _round_down(n, m):
    return (n // m) * m


def _sublane_multiple(dtype):
    # f32 -> 8, bf16 -> 16, int8/fp8 -> 32.
    return max(8, 32 // jnp.dtype(dtype).itemsize)


def _pick_s2(S, rows_bc, m):
    """Largest divisor of S that is a multiple of 128 and <= _MAX_S2, preferring
    one for which rows_bc * (S // s2) is already a sublane multiple (no row pad)."""
    best, best_aligned = None, None
    for dd in range(1, _MAX_S2 // _LANE + 1):
        s2 = _LANE * dd
        if S % s2 != 0:
            continue
        best = s2
        if (rows_bc * (S // s2)) % m == 0:
            best_aligned = s2
    return best_aligned if best_aligned is not None else best


def _pick_tr(rows_padded, m, s2, itemsize):
    """Row-block size: exact divisor of rows_padded (no over-padding), sized
    from the VMEM budget, preferring >= 2 blocks for v7x megacore."""
    # Per-row VMEM cost (double-buffered): image in + out blocks plus the
    # lane-padded [TR,1] f32 scale/bias columns (512 B per row each).
    bytes_per_row = 2 * s2 * itemsize + 2 * 512
    tr_cap = _round_down(_BLOCK_BYTES // (s2 * itemsize), m)
    tr_cap = min(tr_cap, _round_down(_TOTAL_VMEM_BUDGET // (2 * bytes_per_row), m))
    tr_cap = max(tr_cap, m)

    groups = rows_padded // m
    cands = [d * m for d in range(1, groups + 1)
             if groups % d == 0 and d * m <= tr_cap]
    if not cands:
        cands = [m]
    multi = [t for t in cands if rows_padded // t >= 2]
    # Prefer >= 2 row blocks unless it would halve the block size.
    if multi and multi[-1] * 2 >= cands[-1]:
        return multi[-1]
    return cands[-1]


def normalization_forward(image, mean, std):
    """image: [B, C, H, W]; mean/std: [C] -> normalized [B, C, H, W]."""
    B, C, H, W = image.shape
    dtype = image.dtype
    isz = jnp.dtype(dtype).itemsize
    m = _sublane_multiple(dtype)
    S = H * W
    BC = B * C

    # Fold stats in f32: (x - mean) / std == x * (1/std) + (-mean/std).
    std_f = std.astype(jnp.float32)
    scale = 1.0 / std_f
    bias = -mean.astype(jnp.float32) / std_f

    # Lane-dense 2-D slab; pad the lane axis only for truly ragged sizes.
    x2d = image.reshape(BC, S)
    Sp = S
    if S % _LANE != 0:
        Sp = _round_up(S, _LANE)
        x2d = jnp.pad(x2d, ((0, 0), (0, Sp - S)))

    # Fold spatial into the row axis: [BC, Sp] -> [BC*S1, S2].
    S2 = _pick_s2(Sp, BC, m)
    S1 = Sp // S2
    R = BC * S1
    x2d = x2d.reshape(R, S2)

    # Per-row stats: row = (b, c, s1) -> channel c.
    scale_col = jnp.tile(jnp.repeat(scale, S1), B).reshape(R, 1)
    bias_col = jnp.tile(jnp.repeat(bias, S1), B).reshape(R, 1)

    # Row padding only up to the sublane multiple (at most m-1 rows), and only
    # when the aligned-S2 choice could not avoid it.
    Rp = _round_up(R, m)
    if Rp != R:
        x2d = jnp.pad(x2d, ((0, Rp - R), (0, 0)))
        scale_col = jnp.pad(scale_col, ((0, Rp - R), (0, 0)), constant_values=1.0)
        bias_col = jnp.pad(bias_col, ((0, Rp - R), (0, 0)))

    TR = _pick_tr(Rp, m, S2, isz)
    grid = (Rp // TR,)

    out = pl.pallas_call(
        _normalize_kernel,
        out_shape=jax.ShapeDtypeStruct((Rp, S2), dtype),
        grid_spec=pltpu.PrefetchScalarGridSpec(
            num_scalar_prefetch=0,
            grid=grid,
            in_specs=[
                pl.BlockSpec((TR, S2), lambda i: (i, 0)),
                pl.BlockSpec((TR, 1), lambda i: (i, 0)),
                pl.BlockSpec((TR, 1), lambda i: (i, 0)),
            ],
            out_specs=pl.BlockSpec((TR, S2), lambda i: (i, 0)),
        ),
        compiler_params=pltpu.CompilerParams(
            # Pure streaming op, no reduction axis -> parallel (v7x megacore).
            dimension_semantics=("parallel",),
            vmem_limit_bytes=_VMEM_LIMIT,
        ),
        cost_estimate=pl.CostEstimate(
            flops=2 * Rp * S2,
            bytes_accessed=2 * Rp * S2 * isz + 2 * Rp * 4,
            transcendentals=0,
        ),
    )(x2d, scale_col, bias_col)

    if Rp != R:
        out = out[:R]
    out = out.reshape(BC, Sp)
    if Sp != S:
        out = out[:, :S]
    return out.reshape(B, C, H, W)


if __name__ == "__main__":
    key = jax.random.PRNGKey(0)
    k_img, k_mean, k_std = jax.random.split(key, 3)

    B, C, H, W = 2, 4, 16, 16
    image = jax.random.normal(k_img, (B, C, H, W), dtype=jnp.float32)
    mean = jax.random.uniform(k_mean, (C,), dtype=jnp.float32)
    std = jax.random.uniform(k_std, (C,), dtype=jnp.float32) * 0.5 + 0.5

    out = normalization_forward(image, mean, std)
    jax.block_until_ready(out)

    # Reference: plain JAX broadcasting, same semantics as the PyTorch module.
    ref = (image - mean.reshape(1, C, 1, 1)) / std.reshape(1, C, 1, 1)
    assert out.shape == ref.shape, "shape mismatch vs reference"
    assert jnp.allclose(out, ref, atol=1e-5, rtol=1e-5), "mismatch vs reference"

    print("KERNEL_OK")
</pallas_src>

<mosaic_0001>
module attributes {stable_mosaic.version = 11 : i64} {
  func.func @_normalize_kernel(%arg0: i32, %arg1: memref<8x256xf32, #tpu.memory_space<vmem>>, %arg2: memref<8x1xf32, #tpu.memory_space<vmem>>, %arg3: memref<8x1xf32, #tpu.memory_space<vmem>>, %arg4: memref<8x256xf32, #tpu.memory_space<vmem>>) attributes {dimension_semantics = [#tpu.dimension_semantics<parallel>], iteration_bounds = array<i64: 1>, scalar_prefetch = 0 : i64, scratch_operands = 0 : i64, tpu.core_type = #tpu.core_type<tc>, window_params = [{transform_indices = @transform_0, window_bounds = array<i64: 8, 256>}, {transform_indices = @transform_1, window_bounds = array<i64: 8, 1>}, {transform_indices = @transform_2, window_bounds = array<i64: 8, 1>}, {transform_indices = @transform_3, window_bounds = array<i64: 8, 256>}]} {
    %c0 = arith.constant 0 : index
    %c0_0 = arith.constant 0 : index
    %0 = vector.load %arg1[%c0, %c0_0] : memref<8x256xf32, #tpu.memory_space<vmem>>, vector<8x256xf32>
    %c0_1 = arith.constant 0 : index
    %c0_2 = arith.constant 0 : index
    %1 = vector.load %arg2[%c0_1, %c0_2] : memref<8x1xf32, #tpu.memory_space<vmem>>, vector<8x1xf32>
    %2 = vector.broadcast %1 : vector<8x1xf32> to vector<8x256xf32>
    %3 = arith.mulf %0, %2 : vector<8x256xf32>
    %c0_3 = arith.constant 0 : index
    %c0_4 = arith.constant 0 : index
    %4 = vector.load %arg3[%c0_3, %c0_4] : memref<8x1xf32, #tpu.memory_space<vmem>>, vector<8x1xf32>
    %5 = vector.broadcast %4 : vector<8x1xf32> to vector<8x256xf32>
    %6 = arith.addf %3, %5 : vector<8x256xf32>
    %c0_5 = arith.constant 0 : index
    %c0_6 = arith.constant 0 : index
    %7 = vector.load %arg4[%c0_5, %c0_6] : memref<8x256xf32, #tpu.memory_space<vmem>>, vector<8x256xf32>
    tpu.vector_store %arg4[%c0_5, %c0_6], %6 {strides = array<i32>} : memref<8x256xf32, #tpu.memory_space<vmem>>, vector<8x256xf32>,
    return
  }
  func.func @transform_0(%arg0: i32) -> (i32, i32) {
    %c0_i32 = arith.constant 0 : i32
    %c0_i32_0 = arith.constant 0 : i32
    return %arg0, %c0_i32 : i32, i32
  }
  func.func @transform_1(%arg0: i32) -> (i32, i32) {
    %c0_i32 = arith.constant 0 : i32
    %c0_i32_0 = arith.constant 0 : i32
    return %arg0, %c0_i32 : i32, i32
  }
  func.func @transform_2(%arg0: i32) -> (i32, i32) {
    %c0_i32 = arith.constant 0 : i32
    %c0_i32_0 = arith.constant 0 : i32
    return %arg0, %c0_i32 : i32, i32
  }
  func.func @transform_3(%arg0: i32) -> (i32, i32) {
    %c0_i32 = arith.constant 0 : i32
    %c0_i32_0 = arith.constant 0 : i32
    return %arg0, %c0_i32 : i32, i32
  }
}

</mosaic_0001>

<bundles_post_ra>
// kernel: tpu_custom_call.1
= control target key start
LH: loop header
LB: loop body
LE: loop exit
PB: predicated region body
PF: predicated region fallthrough
CT: control target
= control target key end

     0   :  { %s122_s0 = inlined_call_operand.vmem [shape: f32[8,256], index: 0, kind: input, shape index: {}]   ;;  %s123_s1 = inlined_call_operand.vmem [shape: f32[8,1], index: 1, kind: input, shape index: {}]   ;;  %s124_s2 = inlined_call_operand.vmem [shape: f32[8,1], index: 2, kind: input, shape index: {}]   ;;  %s125_s3 = inlined_call_operand.hbm [shape: f32[8,256], index: 3, kind: output, shape index: {}]  }
   0x1   :  { %v17_v0 = vld [vmem:[%s123_s1] sm:$0xff] }
   0x2   :  { %8 = vsyncpa [#allocation3], 0  ;;  %v76_v1 = vmov 0   ;;  %v25_v2 = vld [vmem:[%s124_s2] sm:$0xff]  ;;  %v16_v5 = vld [vmem:[%s122_s0 + $0x8] sm:$0xff]  ;;  %s77_s20 = smov [#allocation2]  }
   0x3   :  { %51 = vset.pattern.permute.xlu0 %v76_v1  ;;  %v15_v4 = vld [vmem:[%s122_s0] sm:$0xff]  ;;  %s41_s1 = sshll.u32 %s77_s20, 4  ;;  %s42_s1 = int_to_ptr.vmem [resolvable:$true] %s41_s1 }
   0x4   :  { %20 = vperm.xlu0 %51, %v17_v0   ;;  %s52_s2 = scalar_lea.vmem %s42_s1, 256  ;;  %p57_p1 = scmp.lt.s32.totalorder %s42_s1, %s42_s1 }
   0x5   :  { %p53_p0 = scmp.ne.s32.totalorder %s42_s1, %s52_s2  ;;  %p58_p2 = scmp.lt.s32.totalorder %s52_s2, %s52_s2 }
   0x7   :  { %p59_p3 = por %p58_p2, %p57_p1 }
   0x8   :  { %28 = vperm.xlu0 %51, %v25_v2  }
   0x9   :  { %p60_p4 = pnand %p59_p3, %p53_p0 }
  0x83   :  { %v21_v3 = vpop.permute.xlu0 %20 }
  0x84   :  { %v23_v6 = vmul.f32 %v21_v3, %v15_v4  ;;  %v24_v7 = vmul.f32 %v21_v3, %v16_v5 }
  0x87   :  { %v29_v8 = vpop.permute.xlu0 %28 }
  0x88   :  { %v31_v9 = vadd.f32 %v29_v8, %v23_v6  ;;  %v32_v10 = vadd.f32 %v29_v8, %v24_v7 }
  0x8a   :  { %33 = vst [vmem:[#allocation2] sm:$0xff] %v31_v9  ;;  %34 = vst [vmem:[#allocation2 + $0x8] sm:$0xff] %v32_v10 }
  0x8b   :  { %63 = shalt.err (!%p60_p4)
}
  0x8c   :  { %s64_s0 = scalar_lea.hbm %s125_s3, 256 }
  0x8d   :  { %p65_p5 = scmp.ne.s32.totalorder %s125_s3, %s64_s0  ;;  %p68_p6 = scmp.lt.u32.totalorder %s64_s0, %s125_s3 }
  0x8f   :  { %p70_p7 = pnand %p68_p6, %p65_p5 }
  0x91   :  { %73 = shalt.err (!%p70_p7)
}
  0x92   :  { %44 = dma.vmem_to_hbm [thread:$0]  %s42_s1, 256, %s125_s3, [#allocation3]  }
  0x93   :  { %74 = dma.done.wait [#allocation3], 256  }
  0x94   :  { %75 = vsyncadd [#allocation3], 4294967040 }
  0x95   :  { %48 = vsyncpa [#allocation3], 1 }

</bundles_post_ra>
